<compile_context>
chip_gen: v5e
topology: v5e:2x2
jax: 0.10.0
libtpu: 0.0.40
codegen_flags: <defaults>
</compile_context>

<pallas_src>
import jax
import jax.numpy as jnp
from jax.experimental import pallas as pl
from jax.experimental.pallas import tpu as pltpu


# ----------------------------- kernel ---------------------------------------
def _head_kernel(x_ref, v_ref, wc_ref, bc_ref, wvd_ref, wr_ref, br_ref, out_ref):
    x = x_ref[...]                                   # (TM, p*n_input)
    v = v_ref[...]                                   # (TM, p*n_view)

    # [h_pre | sigma_pre] per point block:  x @ Wc + bc   (Wc block-diagonal)
    hs = jnp.dot(x, wc_ref[...], preferred_element_type=jnp.float32) + bc_ref[...]
    # View-dir contribution (zero column on each sigma lane keeps sigma exact),
    # then a single relu covers both the h path and sigma's relu.
    hs = hs + jnp.dot(v, wvd_ref[...], preferred_element_type=jnp.float32)
    hs = jnp.maximum(hs, 0.0)                        # (TM, p*(n_half+1))

    # One matmul produces [rgb_pre(3) | sigma(1)] per point block; the sigma
    # column of Wr4 is the unit vector e_{n_half}, its bias is 0.
    z = jnp.dot(hs.astype(wr_ref.dtype), wr_ref[...],
                preferred_element_type=jnp.float32) + br_ref[...]   # (TM, 4p)

    lane = jax.lax.broadcasted_iota(jnp.int32, z.shape, dimension=1)
    out = jnp.where(lane % 4 < 3, jax.nn.sigmoid(z), z)
    out_ref[...] = out.astype(out_ref.dtype)         # single full-block store


# ----------------------------- wrapper helpers -------------------------------
def _round_up(a, b):
    return ((a + b - 1) // b) * b


def _block_diag(w, p):
    """(k, m) -> (p*k, p*m) block-diagonal replication."""
    k, m = w.shape
    eye = jnp.eye(p, dtype=w.dtype)
    return (eye[:, None, :, None] * w[None, :, None, :]).reshape(p * k, p * m)


def _auto_pack_factor(n_input):
    """Pick p so p*n_input ~ fills the MXU K dimension of this chip."""
    k_target = 256                                   # v6e / v7x MXU K
    try:
        kind = jax.devices()[0].device_kind.lower()
        if any(t in kind for t in ("v5 lite", "v5e", "v5lite", "v4", "v3", "v2")):
            k_target = 128                           # 128-wide MXU generations
    except Exception:
        pass
    return max(1, min(64, k_target // max(1, n_input)))


# ----------------------------- public entry ----------------------------------
def view_dependent_head(x, view_dirs, params, *, tm=8192, pack=None, use_bf16=False):
    """x: (..., n_input), view_dirs: (..., n_view) -> (rgb (...,3), sigma (...,1))."""
    n_input = x.shape[-1]
    n_view = view_dirs.shape[-1]
    n_half = n_input // 2
    lead = x.shape[:-1]

    x2 = x.reshape(-1, n_input)
    v2 = view_dirs.reshape(-1, n_view)
    n = x2.shape[0]

    p = _auto_pack_factor(n_input) if pack is None else max(1, int(pack))

    # ---- weight folding / fusion (one-time, tiny) ---------------------------
    wf, bf, wa, ba, wv, bv, wr, br = params
    wvx = wv[:n_input]                               # (n_input, n_half)
    wvd = wv[n_input:]                               # (n_view,  n_half)
    hp = jax.lax.Precision.HIGHEST                   # keep the fold at f32 accuracy
    w_fold = jnp.dot(wf, wvx, precision=hp)          # (n_input, n_half)
    b_fold = jnp.dot(bf[None, :], wvx, precision=hp)[0] + bv

    wc = jnp.concatenate([w_fold, wa], axis=1)                          # (n_input, n_half+1)
    bc = jnp.concatenate([b_fold, ba])                                  # (n_half+1,)
    wvd_ext = jnp.concatenate(                                          # zero sigma column
        [wvd, jnp.zeros((n_view, 1), wvd.dtype)], axis=1)               # (n_view, n_half+1)
    wr4 = jnp.zeros((n_half + 1, 4), wr.dtype)                          # [rgb | sigma pass-through]
    wr4 = wr4.at[:n_half, :3].set(wr).at[n_half, 3].set(1.0)
    br4 = jnp.concatenate([br, jnp.zeros((1,), br.dtype)])              # (4,)

    # ---- lane packing: p points per MXU pass ---------------------------------
    n_pad = _round_up(max(n, 1), 8 * p)              # packed rows end up a multiple of 8
    if n_pad != n:
        x2 = jnp.pad(x2, ((0, n_pad - n), (0, 0)))
        v2 = jnp.pad(v2, ((0, n_pad - n), (0, 0)))
    rows = n_pad // p
    x2p = x2.reshape(rows, p * n_input)              # free contiguous reshape
    v2p = v2.reshape(rows, p * n_view)

    wc_bd = _block_diag(wc, p)                       # (p*n_input,  p*(n_half+1))
    wvd_bd = _block_diag(wvd_ext, p)                 # (p*n_view,   p*(n_half+1))
    wr_bd = _block_diag(wr4, p)                      # (p*(n_half+1), 4p)
    bc_bd = jnp.tile(bc, p).reshape(1, p * (n_half + 1))
    br_bd = jnp.tile(br4, p).reshape(1, 4 * p)

    if use_bf16:                                     # accuracy trade-off, gated
        x2p, v2p = x2p.astype(jnp.bfloat16), v2p.astype(jnp.bfloat16)
        wc_bd, wvd_bd, wr_bd = (w.astype(jnp.bfloat16) for w in (wc_bd, wvd_bd, wr_bd))

    # ---- tiling ---------------------------------------------------------------
    tm_p = max(8, min(tm // p, rows))
    tm_p = max(8, (tm_p // 8) * 8)
    steps = pl.cdiv(rows, tm_p)
    if steps > 1 and steps % 2 == 1:                 # balance across v7x's 2 TCs
        steps += 1
        tm_p = max(8, _round_up(pl.cdiv(rows, steps), 8))
    grid = (pl.cdiv(rows, tm_p),)

    kc, kv_, nc, no = p * n_input, p * n_view, p * (n_half + 1), 4 * p
    row_spec = lambda cols: pl.BlockSpec((tm_p, cols), lambda i: (i, 0))
    full_spec = lambda shape: pl.BlockSpec(shape, lambda i: (0, 0))

    in_itemsize = 2 if use_bf16 else 4
    w_bytes = in_itemsize * (wc_bd.size + wvd_bd.size + wr_bd.size) + 4 * (bc_bd.size + br_bd.size)
    flops = 2 * rows * (kc * nc + kv_ * nc + nc * no)        # dense (block-diag) MXU work
    bytes_accessed = rows * ((kc + kv_) * in_itemsize + no * jnp.dtype(x.dtype).itemsize) + w_bytes

    out = pl.pallas_call(
        _head_kernel,
        out_shape=jax.ShapeDtypeStruct((rows, no), x.dtype),
        grid_spec=pltpu.PrefetchScalarGridSpec(
            num_scalar_prefetch=0,
            grid=grid,
            in_specs=[
                row_spec(kc),                    # packed x tile
                row_spec(kv_),                   # packed view_dirs tile
                full_spec((kc, nc)),             # block-diag Wc = [Wf@Wvx | Wa]
                full_spec((1, nc)),              # bc
                full_spec((kv_, nc)),            # block-diag Wvd (+ zero sigma cols)
                full_spec((nc, no)),             # block-diag Wr4 (rgb + sigma pass-through)
                full_spec((1, no)),              # br4
            ],
            out_specs=pl.BlockSpec((tm_p, no), lambda i: (i, 0)),   # [rgb|sigma] per point
        ),
        compiler_params=pltpu.CompilerParams(
            dimension_semantics=("parallel",)),
        cost_estimate=pl.CostEstimate(
            flops=flops, transcendentals=rows * no, bytes_accessed=bytes_accessed),
    )(x2p, v2p, wc_bd, bc_bd, wvd_bd, wr_bd, br_bd)

    out = out.reshape(n_pad, 4)[:n]                  # drop pad rows (garbage never escapes)
    rgb = out[:, :3].reshape(*lead, 3)
    sigma = out[:, 3:].reshape(*lead, 1)
    return rgb, sigma


# ----------------------------- params / reference ----------------------------
def init_params(key, n_input, n_view, dtype=jnp.float32):
    """Deterministic synthetic parameters; weights stored as (in, out)."""
    n_half = n_input // 2
    ks = jax.random.split(key, 8)
    s = 0.1
    wf = jax.random.normal(ks[0], (n_input, n_input), dtype) * s
    bf = jax.random.normal(ks[1], (n_input,), dtype) * s
    wa = jax.random.normal(ks[2], (n_input, 1), dtype) * s
    ba = jax.random.normal(ks[3], (1,), dtype) * s
    wv = jax.random.normal(ks[4], (n_input + n_view, n_half), dtype) * s
    bv = jax.random.normal(ks[5], (n_half,), dtype) * s
    wr = jax.random.normal(ks[6], (n_half, 3), dtype) * s
    br = jax.random.normal(ks[7], (3,), dtype) * s
    return (wf, bf, wa, ba, wv, bv, wr, br)


def reference(x, view_dirs, params):
    """Pure-JAX reference mirroring the PyTorch forward."""
    (wf, bf, wa, ba, wv, bv, wr, br) = params
    feature = x @ wf + bf
    sigma = jax.nn.relu(x @ wa + ba)
    feature = jnp.concatenate([feature, view_dirs], axis=-1)
    feature = jax.nn.relu(feature @ wv + bv)
    rgb = jax.nn.sigmoid(feature @ wr + br)
    return rgb, sigma


if __name__ == "__main__":
    import numpy as np

    n_input, n_view = 32, 8
    batch, seq = 2, 8            # x: (2, 8, 32), view_dirs: (2, 8, 8)

    key = jax.random.PRNGKey(0)
    kx, kv, kp = jax.random.split(key, 3)
    x = jax.random.normal(kx, (batch, seq, n_input), jnp.float32)
    view_dirs = jax.random.normal(kv, (batch, seq, n_view), jnp.float32)
    params = init_params(kp, n_input, n_view)

    rgb, sigma = view_dependent_head(x, view_dirs, params)
    rgb = jax.block_until_ready(rgb)
    sigma = jax.block_until_ready(sigma)

    rgb_ref, sigma_ref = reference(x, view_dirs, params)
    np.testing.assert_allclose(np.asarray(rgb), np.asarray(rgb_ref), rtol=1e-5, atol=1e-5)
    np.testing.assert_allclose(np.asarray(sigma), np.asarray(sigma_ref), rtol=1e-5, atol=1e-5)

    assert rgb.shape == (batch, seq, 3) and sigma.shape == (batch, seq, 1)
    print("KERNEL_OK")
</pallas_src>

<mosaic_0001>
module attributes {stable_mosaic.version = 11 : i64} {
  func.func @_head_kernel(%arg0: i32, %arg1: memref<8x256xf32, #tpu.memory_space<vmem>>, %arg2: memref<8x64xf32, #tpu.memory_space<vmem>>, %arg3: memref<256x136xf32, #tpu.memory_space<vmem>>, %arg4: memref<1x136xf32, #tpu.memory_space<vmem>>, %arg5: memref<64x136xf32, #tpu.memory_space<vmem>>, %arg6: memref<136x32xf32, #tpu.memory_space<vmem>>, %arg7: memref<1x32xf32, #tpu.memory_space<vmem>>, %arg8: memref<8x32xf32, #tpu.memory_space<vmem>>) attributes {dimension_semantics = [#tpu.dimension_semantics<parallel>], iteration_bounds = array<i64: 1>, scalar_prefetch = 0 : i64, scratch_operands = 0 : i64, tpu.core_type = #tpu.core_type<tc>, window_params = [{transform_indices = @transform_0, window_bounds = array<i64: 8, 256>}, {transform_indices = @transform_1, window_bounds = array<i64: 8, 64>}, {pipeline_mode = #tpu.pipeline_mode<synchronous>, transform_indices = @transform_2, window_bounds = array<i64: 256, 136>}, {pipeline_mode = #tpu.pipeline_mode<synchronous>, transform_indices = @transform_3, window_bounds = array<i64: 1, 136>}, {pipeline_mode = #tpu.pipeline_mode<synchronous>, transform_indices = @transform_4, window_bounds = array<i64: 64, 136>}, {pipeline_mode = #tpu.pipeline_mode<synchronous>, transform_indices = @transform_5, window_bounds = array<i64: 136, 32>}, {pipeline_mode = #tpu.pipeline_mode<synchronous>, transform_indices = @transform_6, window_bounds = array<i64: 1, 32>}, {transform_indices = @transform_7, window_bounds = array<i64: 8, 32>}]} {
    %c0 = arith.constant 0 : index
    %c0_0 = arith.constant 0 : index
    %0 = vector.load %arg1[%c0, %c0_0] : memref<8x256xf32, #tpu.memory_space<vmem>>, vector<8x256xf32>
    %c0_1 = arith.constant 0 : index
    %c0_2 = arith.constant 0 : index
    %1 = vector.load %arg2[%c0_1, %c0_2] : memref<8x64xf32, #tpu.memory_space<vmem>>, vector<8x64xf32>
    %c0_3 = arith.constant 0 : index
    %c0_4 = arith.constant 0 : index
    %2 = vector.load %arg3[%c0_3, %c0_4] : memref<256x136xf32, #tpu.memory_space<vmem>>, vector<256x136xf32>
    %cst = arith.constant dense<0.000000e+00> : vector<8x136xf32>
    %3 = tpu.matmul %0, %2, %cst {dimension_numbers = #tpu.dot_dimension_numbers<[1], [0], [0], [1], [0, 0, 1, 1], [], []>} : vector<8x256xf32>, vector<256x136xf32>, vector<8x136xf32> -> vector<8x136xf32>
    %c0_5 = arith.constant 0 : index
    %c0_6 = arith.constant 0 : index
    %4 = vector.load %arg4[%c0_5, %c0_6] : memref<1x136xf32, #tpu.memory_space<vmem>>, vector<1x136xf32>
    %5 = vector.broadcast %4 : vector<1x136xf32> to vector<8x136xf32>
    %6 = arith.addf %3, %5 : vector<8x136xf32>
    %c0_7 = arith.constant 0 : index
    %c0_8 = arith.constant 0 : index
    %7 = vector.load %arg5[%c0_7, %c0_8] : memref<64x136xf32, #tpu.memory_space<vmem>>, vector<64x136xf32>
    %cst_9 = arith.constant dense<0.000000e+00> : vector<8x136xf32>
    %8 = tpu.matmul %1, %7, %cst_9 {dimension_numbers = #tpu.dot_dimension_numbers<[1], [0], [0], [1], [0, 0, 1, 1], [], []>} : vector<8x64xf32>, vector<64x136xf32>, vector<8x136xf32> -> vector<8x136xf32>
    %9 = arith.addf %6, %8 : vector<8x136xf32>
    %cst_10 = arith.constant 0.000000e+00 : f32
    %10 = vector.broadcast %cst_10 : f32 to vector<8x136xf32>
    %11 = arith.maximumf %9, %10 : vector<8x136xf32>
    %c0_11 = arith.constant 0 : index
    %c0_12 = arith.constant 0 : index
    %12 = vector.load %arg6[%c0_11, %c0_12] : memref<136x32xf32, #tpu.memory_space<vmem>>, vector<136x32xf32>
    %cst_13 = arith.constant dense<0.000000e+00> : vector<8x32xf32>
    %13 = tpu.matmul %11, %12, %cst_13 {dimension_numbers = #tpu.dot_dimension_numbers<[1], [0], [0], [1], [0, 0, 1, 1], [], []>} : vector<8x136xf32>, vector<136x32xf32>, vector<8x32xf32> -> vector<8x32xf32>
    %c0_14 = arith.constant 0 : index
    %c0_15 = arith.constant 0 : index
    %14 = vector.load %arg7[%c0_14, %c0_15] : memref<1x32xf32, #tpu.memory_space<vmem>>, vector<1x32xf32>
    %15 = vector.broadcast %14 : vector<1x32xf32> to vector<8x32xf32>
    %16 = arith.addf %13, %15 : vector<8x32xf32>
    %17 = tpu.iota {dimensions = array<i32: 1>} : vector<8x32xi32>
    %c4_i32 = arith.constant 4 : i32
    %c0_i32 = arith.constant 0 : i32
    %18 = arith.cmpi eq, %c4_i32, %c0_i32 : i32
    %c1_i32 = arith.constant 1 : i32
    %19 = arith.select %18, %c1_i32, %c4_i32 : i32
    %20 = vector.broadcast %19 : i32 to vector<8x32xi32>
    %21 = arith.remsi %17, %20 : vector<8x32xi32>
    %c0_i32_16 = arith.constant 0 : i32
    %22 = vector.broadcast %c0_i32_16 : i32 to vector<8x32xi32>
    %23 = arith.cmpi ne, %21, %22 : vector<8x32xi32>
    %c0_i32_17 = arith.constant 0 : i32
    %24 = vector.broadcast %c0_i32_17 : i32 to vector<8x32xi32>
    %25 = arith.cmpi slt, %21, %24 : vector<8x32xi32>
    %c0_i32_18 = arith.constant 0 : i32
    %26 = arith.cmpi slt, %19, %c0_i32_18 : i32
    %27 = vector.broadcast %26 : i1 to vector<8x32xi1>
    %28 = vector.broadcast %27 : vector<8x32xi1> to vector<8x32xi1>
    %29 = arith.xori %25, %28 : vector<8x32xi1>
    %30 = arith.andi %29, %23 : vector<8x32xi1>
    %31 = vector.broadcast %19 : i32 to vector<8x32xi32>
    %32 = arith.addi %21, %31 : vector<8x32xi32>
    %33 = arith.select %30, %32, %21 : vector<8x32xi1>, vector<8x32xi32>
    %c3_i32 = arith.constant 3 : i32
    %34 = vector.broadcast %c3_i32 : i32 to vector<8x32xi32>
    %35 = arith.cmpi slt, %33, %34 : vector<8x32xi32>
    %36 = arith.negf %16 : vector<8x32xf32>
    %37 = math.exp %36 : vector<8x32xf32>
    %cst_19 = arith.constant 1.000000e+00 : f32
    %38 = vector.broadcast %cst_19 : f32 to vector<8x32xf32>
    %39 = arith.addf %38, %37 : vector<8x32xf32>
    %40 = arith.divf %38, %39 : vector<8x32xf32>
    %41 = arith.select %35, %40, %16 : vector<8x32xi1>, vector<8x32xf32>
    %c0_20 = arith.constant 0 : index
    %c0_21 = arith.constant 0 : index
    %42 = vector.load %arg8[%c0_20, %c0_21] : memref<8x32xf32, #tpu.memory_space<vmem>>, vector<8x32xf32>
    tpu.vector_store %arg8[%c0_20, %c0_21], %41 {strides = array<i32>} : memref<8x32xf32, #tpu.memory_space<vmem>>, vector<8x32xf32>,
    return
  }
  func.func @transform_0(%arg0: i32) -> (i32, i32) {
    %c0_i32 = arith.constant 0 : i32
    %c0_i32_0 = arith.constant 0 : i32
    return %arg0, %c0_i32 : i32, i32
  }
  func.func @transform_1(%arg0: i32) -> (i32, i32) {
    %c0_i32 = arith.constant 0 : i32
    %c0_i32_0 = arith.constant 0 : i32
    return %arg0, %c0_i32 : i32, i32
  }
  func.func @transform_2(%arg0: i32) -> (i32, i32) {
    %c0_i32 = arith.constant 0 : i32
    %c0_i32_0 = arith.constant 0 : i32
    %c0_i32_1 = arith.constant 0 : i32
    return %c0_i32, %c0_i32_0 : i32, i32
  }
  func.func @transform_3(%arg0: i32) -> (i32, i32) {
    %c0_i32 = arith.constant 0 : i32
    %c0_i32_0 = arith.constant 0 : i32
    %c0_i32_1 = arith.constant 0 : i32
    return %c0_i32, %c0_i32_0 : i32, i32
  }
  func.func @transform_4(%arg0: i32) -> (i32, i32) {
    %c0_i32 = arith.constant 0 : i32
    %c0_i32_0 = arith.constant 0 : i32
    %c0_i32_1 = arith.constant 0 : i32
    return %c0_i32, %c0_i32_0 : i32, i32
  }
  func.func @transform_5(%arg0: i32) -> (i32, i32) {
    %c0_i32 = arith.constant 0 : i32
    %c0_i32_0 = arith.constant 0 : i32
    %c0_i32_1 = arith.constant 0 : i32
    return %c0_i32, %c0_i32_0 : i32, i32
  }
  func.func @transform_6(%arg0: i32) -> (i32, i32) {
    %c0_i32 = arith.constant 0 : i32
    %c0_i32_0 = arith.constant 0 : i32
    %c0_i32_1 = arith.constant 0 : i32
    return %c0_i32, %c0_i32_0 : i32, i32
  }
  func.func @transform_7(%arg0: i32) -> (i32, i32) {
    %c0_i32 = arith.constant 0 : i32
    %c0_i32_0 = arith.constant 0 : i32
    return %arg0, %c0_i32 : i32, i32
  }
}

</mosaic_0001>

<bundles_post_ra>
// kernel: tpu_custom_call.1
= control target key start
LH: loop header
LB: loop body
LE: loop exit
PB: predicated region body
PF: predicated region fallthrough
CT: control target
= control target key end

     0   :  { %s748_s0 = inlined_call_operand.vmem [shape: f32[8,256], index: 0, kind: input, shape index: {}]   ;;  %s749_s1 = inlined_call_operand.vmem [shape: f32[8,64], index: 1, kind: input, shape index: {}]   ;;  %s750_s2 = inlined_call_operand.vmem [shape: f32[256,136], index: 2, kind: input, shape index: {}]   ;;  %s751_s3 = inlined_call_operand.vmem [shape: f32[1,136], index: 3, kind: input, shape index: {}]   ;;  %s752_s4 = inlined_call_operand.vmem [shape: f32[64,136], index: 4, kind: input, shape index: {}]   ;;  %s753_s5 = inlined_call_operand.vmem [shape: f32[136,32], index: 5, kind: input, shape index: {}]   ;;  %s754_s6 = inlined_call_operand.vmem [shape: f32[1,32], index: 6, kind: input, shape index: {}]   ;;  %s755_s7 = inlined_call_operand.hbm [shape: f32[8,32], index: 7, kind: output, shape index: {}]  }
   0x1   :  { %v60_v0 = vld [vmem:[%s750_s2 + $0xf0] sm:$0xff]  ;;  %v58_v1 = vld [vmem:[%s750_s2 + $0xe0] sm:$0xff]  ;;  %v61_v6 = vld [vmem:[%s750_s2 + $0xf8] sm:$0xff] }
   0x2   :  { %v92_v2 = vld [vmem:[%s750_s2 + $0x1f0] sm:$0xff]  ;;  %100 = vmatpush.msra.mxu0 %v60_v0  ;;  %v90_v3 = vld [vmem:[%s750_s2 + $0x1e0] sm:$0xff]  ;;  %v59_v7 = vld [vmem:[%s750_s2 + $0xe8] sm:$0xff]  ;;  %140 = vmatpush.msra.mxu2 %v61_v6 }
   0x3   :  { %120 = vmatpush.msra.mxu1 %v92_v2  ;;  %v56_v4 = vld [vmem:[%s750_s2 + $0xd0] sm:$0xff]  ;;  %v93_v8 = vld [vmem:[%s750_s2 + $0x1f8] sm:$0xff]  ;;  %v54_v9 = vld [vmem:[%s750_s2 + $0xc0] sm:$0xff] }
   0x4   :  { %v88_v5 = vld [vmem:[%s750_s2 + $0x1d0] sm:$0xff]  ;;  %101 = vmatpush.msra.mxu0 %v58_v1  ;;  %v86_v10 = vld [vmem:[%s750_s2 + $0x1c0] sm:$0xff]  ;;  %160 = vmatpush.msra.mxu3 %v93_v8  ;;  %v57_v11 = vld [vmem:[%s750_s2 + $0xd8] sm:$0xff] }
   0x5   :  { %121 = vmatpush.msra.mxu1 %v90_v3  ;;  %v91_v12 = vld [vmem:[%s750_s2 + $0x1e8] sm:$0xff]  ;;  %v52_v13 = vld [vmem:[%s750_s2 + $0xb0] sm:$0xff]  ;;  %141 = vmatpush.msra.mxu2 %v59_v7  ;;  %v89_v15 = vld [vmem:[%s750_s2 + $0x1d8] sm:$0xff] }
   0x6   :  { %102 = vmatpush.msra.mxu0 %v56_v4  ;;  %v84_v14 = vld [vmem:[%s750_s2 + $0x1b0] sm:$0xff]  ;;  %161 = vmatpush.msra.mxu3 %v91_v12  ;;  %v55_v16 = vld [vmem:[%s750_s2 + $0xc8] sm:$0xff]  ;;  %v50_v18 = vld [vmem:[%s750_s2 + $0xa0] sm:$0xff] }
   0x7   :  { %122 = vmatpush.msra.mxu1 %v88_v5  ;;  %v87_v17 = vld [vmem:[%s750_s2 + $0x1c8] sm:$0xff]  ;;  %142 = vmatpush.msra.mxu2 %v57_v11  ;;  %v82_v19 = vld [vmem:[%s750_s2 + $0x1a0] sm:$0xff]  ;;  %v53_v20 = vld [vmem:[%s750_s2 + $0xb8] sm:$0xff] }
   0x8   :  { %103 = vmatpush.msra.mxu0 %v54_v9  ;;  %162 = vmatpush.msra.mxu3 %v89_v15  ;;  %v85_v21 = vld [vmem:[%s750_s2 + $0x1b8] sm:$0xff]  ;;  %v48_v22 = vld [vmem:[%s750_s2 + $0x90] sm:$0xff]  ;;  %v51_v24 = vld [vmem:[%s750_s2 + $0xa8] sm:$0xff] }
   0x9   :  { %123 = vmatpush.msra.mxu1 %v86_v10  ;;  %143 = vmatpush.msra.mxu2 %v55_v16  ;;  %v80_v23 = vld [vmem:[%s750_s2 + $0x190] sm:$0xff]  ;;  %v83_v25 = vld [vmem:[%s750_s2 + $0x1a8] sm:$0xff]  ;;  %v46_v26 = vld [vmem:[%s750_s2 + $0x80] sm:$0xff] }
   0xa   :  { %104 = vmatpush.msra.mxu0 %v52_v13  ;;  %163 = vmatpush.msra.mxu3 %v87_v17  ;;  %v78_v27 = vld [vmem:[%s750_s2 + $0x180] sm:$0xff]  ;;  %v49_v28 = vld [vmem:[%s750_s2 + $0x98] sm:$0xff]  ;;  %v44_v30 = vld [vmem:[%s750_s2 + $0x70] sm:$0xff] }
   0xb   :  { %124 = vmatpush.msra.mxu1 %v84_v14  ;;  %144 = vmatpush.msra.mxu2 %v53_v20  ;;  %v81_v29 = vld [vmem:[%s750_s2 + $0x198] sm:$0xff]  ;;  %v76_v31 = vld [vmem:[%s750_s2 + $0x170] sm:$0xff]  ;;  %v47_v32 = vld [vmem:[%s750_s2 + $0x88] sm:$0xff] }
   0xc   :  { %105 = vmatpush.msra.mxu0 %v50_v18  ;;  %164 = vmatpush.msra.mxu3 %v85_v21  ;;  %v79_v33 = vld [vmem:[%s750_s2 + $0x188] sm:$0xff]  ;;  %v42_v34 = vld [vmem:[%s750_s2 + $0x60] sm:$0xff]  ;;  %v45_v36 = vld [vmem:[%s750_s2 + $0x78] sm:$0xff] }
   0xd   :  { %125 = vmatpush.msra.mxu1 %v82_v19  ;;  %145 = vmatpush.msra.mxu2 %v51_v24  ;;  %v74_v35 = vld [vmem:[%s750_s2 + $0x160] sm:$0xff]  ;;  %v77_v37 = vld [vmem:[%s750_s2 + $0x178] sm:$0xff]  ;;  %v40_v38 = vld [vmem:[%s750_s2 + $0x50] sm:$0xff] }
   0xe   :  { %106 = vmatpush.msra.mxu0 %v48_v22  ;;  %165 = vmatpush.msra.mxu3 %v83_v25  ;;  %v72_v39 = vld [vmem:[%s750_s2 + $0x150] sm:$0xff]  ;;  %v43_v40 = vld [vmem:[%s750_s2 + $0x68] sm:$0xff]  ;;  %v38_v42 = vld [vmem:[%s750_s2 + $0x40] sm:$0xff] }
   0xf   :  { %126 = vmatpush.msra.mxu1 %v80_v23  ;;  %146 = vmatpush.msra.mxu2 %v49_v28  ;;  %v75_v41 = vld [vmem:[%s750_s2 + $0x168] sm:$0xff]  ;;  %v70_v43 = vld [vmem:[%s750_s2 + $0x140] sm:$0xff]  ;;  %v41_v44 = vld [vmem:[%s750_s2 + $0x58] sm:$0xff] }
  0x10   :  { %107 = vmatpush.msra.mxu0 %v46_v26  ;;  %166 = vmatpush.msra.mxu3 %v81_v29  ;;  %v73_v45 = vld [vmem:[%s750_s2 + $0x158] sm:$0xff]  ;;  %v36_v46 = vld [vmem:[%s750_s2 + $0x30] sm:$0xff]  ;;  %v39_v48 = vld [vmem:[%s750_s2 + $0x48] sm:$0xff] }
  0x11   :  { %127 = vmatpush.msra.mxu1 %v78_v27  ;;  %147 = vmatpush.msra.mxu2 %v47_v32  ;;  %v68_v47 = vld [vmem:[%s750_s2 + $0x130] sm:$0xff]  ;;  %v71_v49 = vld [vmem:[%s750_s2 + $0x148] sm:$0xff]  ;;  %v34_v50 = vld [vmem:[%s750_s2 + $0x20] sm:$0xff] }
  0x12   :  { %108 = vmatpush.msra.mxu0 %v44_v30  ;;  %167 = vmatpush.msra.mxu3 %v79_v33  ;;  %v66_v51 = vld [vmem:[%s750_s2 + $0x120] sm:$0xff]  ;;  %v37_v52 = vld [vmem:[%s750_s2 + $0x38] sm:$0xff]  ;;  %v32_v54 = vld [vmem:[%s750_s2 + $0x10] sm:$0xff] }
  0x13   :  { %128 = vmatpush.msra.mxu1 %v76_v31  ;;  %148 = vmatpush.msra.mxu2 %v45_v36  ;;  %v69_v53 = vld [vmem:[%s750_s2 + $0x138] sm:$0xff]  ;;  %v64_v55 = vld [vmem:[%s750_s2 + $0x110] sm:$0xff]  ;;  %v35_v56 = vld [vmem:[%s750_s2 + $0x28] sm:$0xff] }
  0x14   :  { %109 = vmatpush.msra.mxu0 %v42_v34  ;;  %168 = vmatpush.msra.mxu3 %v77_v37  ;;  %v67_v57 = vld [vmem:[%s750_s2 + $0x128] sm:$0xff]  ;;  %v30_v58 = vld [vmem:[%s750_s2] sm:$0xff]  ;;  %v194_v60 = vld [vmem:[%s752_s4 + $0x70] sm:$0xff] }
  0x15   :  { %129 = vmatpush.msra.mxu1 %v74_v35  ;;  %149 = vmatpush.msra.mxu2 %v43_v40  ;;  %v62_v59 = vld [vmem:[%s750_s2 + $0x100] sm:$0xff]  ;;  %v195_v61 = vld [vmem:[%s752_s4 + $0x78] sm:$0xff]  ;;  %v193_v1 = vld [vmem:[%s752_s4 + $0x68] sm:$0xff] }
  0x16   :  { %110 = vmatpush.msra.mxu0 %v40_v38  ;;  %169 = vmatpush.msra.mxu3 %v75_v41  ;;  %v192_v62 = vld [vmem:[%s752_s4 + $0x60] sm:$0xff]  ;;  %v33_v63 = vld [vmem:[%s750_s2 + $0x18] sm:$0xff] }
  0x17   :  { %130 = vmatpush.msra.mxu1 %v72_v39  ;;  %150 = vmatpush.msra.mxu2 %v41_v44  ;;  %v65_v0 = vld [vmem:[%s750_s2 + $0x118] sm:$0xff] }
  0x18   :  { %111 = vmatpush.msra.mxu0 %v38_v42  ;;  %170 = vmatpush.msra.mxu3 %v73_v45 }
  0x19   :  { %131 = vmatpush.msra.mxu1 %v70_v43  ;;  %151 = vmatpush.msra.mxu2 %v39_v48 }
  0x1a   :  { %112 = vmatpush.msra.mxu0 %v36_v46  ;;  %171 = vmatpush.msra.mxu3 %v71_v49 }
  0x1b   :  { %132 = vmatpush.msra.mxu1 %v68_v47  ;;  %152 = vmatpush.msra.mxu2 %v37_v52 }
  0x1c   :  { %113 = vmatpush.msra.mxu0 %v34_v50  ;;  %172 = vmatpush.msra.mxu3 %v69_v53 }
  0x1d   :  { %133 = vmatpush.msra.mxu1 %v66_v51  ;;  %153 = vmatpush.msra.mxu2 %v35_v56 }
  0x1e   :  { %114 = vmatpush.msra.mxu0 %v32_v54  ;;  %173 = vmatpush.msra.mxu3 %v67_v57 }
  0x1f   :  { %134 = vmatpush.msra.mxu1 %v64_v55 }
  0x20   :  { %115 = vmatpush.msra.mxu0 %v30_v58 }
  0x21   :  { %135 = vmatpush.msra.mxu1 %v62_v59 }
  0x22   :  { %12 = vsyncpa [#allocation3], 0  ;;  %208 = vmatpush.msrb.mxu0 %v194_v60  ;;  %v31_v2 = vld [vmem:[%s750_s2 + $0x8] sm:$0xff]  ;;  %v27_v3 = vld [vmem:[%s748_s0] sm:$0xff]  ;;  %154 = vmatpush.msra.mxu2 %v33_v63  ;;  %vm196_vm0 = vcmask 523264   ;;  %vm265_vm1 = vcmask 64512  }
  0x23   :  { %228 = vmatpush.msrb.mxu1 %v195_v61  ;;  %v190_v4 = vld [vmem:[%s752_s4 + $0x50] sm:$0xff]  ;;  %174 = vmatpush.msra.mxu3 %v65_v0  ;;  %v191_v5 = vld [vmem:[%s752_s4 + $0x58] sm:$0xff]  ;;  %v63_v6 = vld [vmem:[%s750_s2 + $0x108] sm:$0xff]  ;;  %v309_v61 = vlaneseq  ;;  %vm344_vm7 = vcmask 261120  }
  0x24   :  { %209 = vmatpush.msrb.mxu0 %v192_v62  ;;  %155 = vmatpush.msra.mxu2 %v31_v2  ;;  %v188_v7 = vld [vmem:[%s752_s4 + $0x40] sm:$0xff]  ;;  %v189_v8 = vld [vmem:[%s752_s4 + $0x48] sm:$0xff]  ;;  %v186_v10 = vld [vmem:[%s752_s4 + $0x30] sm:$0xff] }
  0x25   :  { %229 = vmatpush.msrb.mxu1 %v193_v1  ;;  %116 = vmatmul.f32.vlgmr.msra.gmra.mxu0 %v27_v3  ;;  %v28_v9 = vld [vmem:[%s748_s0 + $0x8] sm:$0xff]  ;;  %v187_v11 = vld [vmem:[%s752_s4 + $0x38] sm:$0xff]  ;;  %v184_v13 = vld [vmem:[%s752_s4 + $0x20] sm:$0xff]  ;;  %v310_v63 = vand.u32 127, %v309_v61 }
  0x26   :  { %210 = vmatpush.msrb.mxu0 %v190_v4  ;;  %156 = vmatmul.f32.vlgmr.msra.gmra.mxu2 %v27_v3  ;;  %v259_v12 = vld [vmem:[%s753_s5 + $0x78] sm:$0xff]  ;;  %v185_v14 = vld [vmem:[%s752_s4 + $0x28] sm:$0xff]  ;;  %v258_v15 = vld [vmem:[%s753_s5 + $0x70] sm:$0xff] }
  0x27   :  { %230 = vmatpush.msrb.mxu1 %v191_v5  ;;  %175 = vmatpush.msra.mxu3 %v63_v6  ;;  %v182_v16 = vld [vmem:[%s752_s4 + $0x10] sm:$0xff]  ;;  %v183_v17 = vld [vmem:[%s752_s4 + $0x18] sm:$0xff]  ;;  %v257_v18 = vld [vmem:[%s753_s5 + $0x68] sm:$0xff]  ;;  %v315_v2 = vand.u32 3, %v310_v63 }
  0x28   :  { %211 = vmatpush.msrb.mxu0 %v188_v7  ;;  %136 = vmatmul.f32.vlgmr.msra.gmra.mxu1 %v28_v9  ;;  %v180_v19 = vld [vmem:[%s752_s4] sm:$0xff]  ;;  %v181_v20 = vld [vmem:[%s752_s4 + $0x8] sm:$0xff]  ;;  %v255_v23 = vld [vmem:[%s753_s5 + $0x58] sm:$0xff] }
  0x29   :  { %231 = vmatpush.msrb.mxu1 %v189_v8  ;;  %176 = vmatmul.f32.vlgmr.msra.gmra.mxu3 %v28_v9  ;;  %v29_v21 = vld [vmem:[%s749_s1] sm:$0xff]  ;;  %v254_v24 = vld [vmem:[%s753_s5 + $0x50] sm:$0xff]  ;;  %v253_v25 = vld [vmem:[%s753_s5 + $0x48] sm:$0xff]  ;;  %s353_s1 = sshll.u32 %s755_s7, 4  ;;  %vm323_vm4 = vcmp.lt.s32.totalorder %v315_v2, 3  ;;  %s354_s1 = int_to_ptr.hbm [resolvable:$true] %s353_s1 }
  0x2a   :  { %212 = vmatpush.msrb.mxu0 %v186_v10  ;;  %269 = vmatpush.msrb.mxu2 %v259_v12  ;;  %v256_v22 = vld [vmem:[%s753_s5 + $0x60] sm:$0xff]  ;;  %v251_v27 = vld [vmem:[%s753_s5 + $0x38] sm:$0xff]  ;;  %v250_v28 = vld [vmem:[%s753_s5 + $0x30] sm:$0xff] }
  0x2b   :  { %232 = vmatpush.msrb.mxu1 %v187_v11  ;;  %v252_v26 = vld [vmem:[%s753_s5 + $0x40] sm:$0xff]  ;;  %v249_v29 = vld [vmem:[%s753_s5 + $0x28] sm:$0xff]  ;;  %v247_v31 = vld [vmem:[%s753_s5 + $0x18] sm:$0xff] }
  0x2c   :  { %213 = vmatpush.msrb.mxu0 %v184_v13  ;;  %270 = vmatpush.msrb.mxu2 %v258_v15  ;;  %v248_v30 = vld [vmem:[%s753_s5 + $0x20] sm:$0xff]  ;;  %v246_v33 = vld [vmem:[%s753_s5 + $0x10] sm:$0xff]  ;;  %v245_v34 = vld [vmem:[%s753_s5 + $0x8] sm:$0xff] }
  0x2d   :  { %233 = vmatpush.msrb.mxu1 %v185_v14  ;;  %v260_v32 = vld [vmem:[%s753_s5 + $0x80] sm:$0xff] }
  0x2e   :  { %214 = vmatpush.msrb.mxu0 %v182_v16  ;;  %271 = vmatpush.msrb.mxu2 %v257_v18  ;;  %v244_v35 = vld [vmem:[%s753_s5] sm:$0xff] }
  0x2f   :  { %234 = vmatpush.msrb.mxu1 %v183_v17  ;;  %304 = vmatpush.msrb.mxu3 %v260_v32  ;;  %v94_v36 = vld [vmem:[%s751_s3] sm:$0x3] }
  0x30   :  { %215 = vmatpush.msrb.mxu0 %v180_v19  ;;  %272 = vmatpush.msrb.mxu2 %v256_v22  ;;  %v96_v38 = vperm.slane %v94_v36, 0  ;;  %v97_v40 = vperm.slane %v94_v36, 1  ;;  %v367_v53 = vld [vmem:[%s754_s6] ss:$0 sm:$0xff]  ;;  %s398_s6 = smov [#allocation2]  }
  0x31   :  { %235 = vmatpush.msrb.mxu1 %v181_v20  ;;  %362 = vmatmul.msk.f32.vlgmr.msrb.gmra.mxu0 %vm196_vm0, %v29_v21  ;;  %s351_s12 = sshll.u32 %s398_s6, 4  ;;  %s352_s12 = int_to_ptr.vmem [resolvable:$true] %s351_s12 }
  0x32   :  { %363 = vmatmul.msk.f32.vlgmr.msrb.gmra.mxu1 %vm196_vm0, %v29_v21  ;;  %273 = vmatpush.msrb.mxu2 %v255_v23 }
  0x34   :  { %274 = vmatpush.msrb.mxu2 %v254_v24 }
  0x36   :  { %275 = vmatpush.msrb.mxu2 %v253_v25 }
  0x38   :  { %276 = vmatpush.msrb.mxu2 %v252_v26 }
  0x3a   :  { %277 = vmatpush.msrb.mxu2 %v251_v27 }
  0x3c   :  { %278 = vmatpush.msrb.mxu2 %v250_v28 }
  0x3e   :  { %279 = vmatpush.msrb.mxu2 %v249_v29 }
  0x40   :  { %280 = vmatpush.msrb.mxu2 %v248_v30 }
  0x42   :  { %281 = vmatpush.msrb.mxu2 %v247_v31 }
  0x44   :  { %282 = vmatpush.msrb.mxu2 %v246_v33 }
  0x46   :  { %283 = vmatpush.msrb.mxu2 %v245_v34 }
  0x48   :  { %284 = vmatpush.msrb.mxu2 %v244_v35 }
  0xa2   :  { %v117_v37 = vpop.f32.mrf.mxu0 }
  0xa3   :  { %v118_v41 = vadd.f32 %v117_v37, %v96_v38 }
  0xa5   :  { %v137_v39 = vpop.f32.mrf.mxu1 }
  0xa6   :  { %v138_v45 = vadd.f32 %v137_v39, %v118_v41 }
  0xa9   :  { %v157_v42 = vpop.f32.mrf.mxu2 }
  0xaa   :  { %v158_v43 = vadd.f32 %v157_v42, %v97_v40 }
  0xac   :  { %v177_v44 = vpop.f32.mrf.mxu3 }
  0xad   :  { %v178_v46 = vadd.f32 %v177_v44, %v158_v43 }
  0xae   :  { %v217_v47 = vpop.f32.mrf.mxu0 }
  0xaf   :  { %v237_v48 = vpop.f32.mrf.mxu1  ;;  %v240_v49 = vadd.f32 %v217_v47, %v138_v45 }
  0xb0   :  { %v241_v50 = vadd.f32 %v237_v48, %v178_v46 }
  0xb1   :  { %v242_v51 = vmax.f32 %v240_v49, 0.0 }
  0xb2   :  { %v243_v52 = vmax.f32 %v241_v50, 0.0 }
  0xb3   :  { %285 = vmatmul.f32.vlgmr.msrb.gmra.mxu2 %v242_v51 }
  0xb4   :  { %364 = vmatmul.msk.f32.vlgmr.msrb.gmra.mxu3 %vm265_vm1, %v243_v52 }
 0x136   :  { %v286_v54 = vpop.f32.mrf.mxu2 }
 0x137   :  { %v306_v55 = vpop.f32.mrf.mxu3  ;;  %v287_v56 = vadd.f32 %v367_v53, %v286_v54 }
 0x139   :  { %v307_v57 = vadd.f32 %v306_v55, %v287_v56 }
 0x13b   :  { %v365_v58 = vmul.f32 -1.442695, %v307_v57 }
 0x13d   :  { %368 = vpow2.f32 %v365_v58 }
 0x143   :  { %v369_v59 = vpop.eup %368 }
 0x144   :  { %v327_v60 = vadd.f32 1.0, %v369_v59 }
 0x146   :  { %370 = vrcp.f32 %v327_v60  ;;  %v339_v3 = vand.u32 2147483648, %v327_v60  ;;  %v337_v5 = vand.u32 2147483647, %v327_v60  ;;  %vm333_vm3 = vweird.f32 %v327_v60 }
 0x148   :  { %v340_v7 = vor.u32 1.1754944e-38, %v339_v3  ;;  %vm338_vm6 = vcmp.eq.f32.partialorder %v337_v5, 8.507059e+37 }
 0x14c   :  { %v371_v62 = vpop.eup %370 }
 0x14d   :  { %v329_v0 = vmul.f32 %v371_v62, %v327_v60  ;;  %vm334_vm2 = vweird.f32 %v371_v62 }
 0x14e   :  { %vm335_vm5 = vmor %vm333_vm3, %vm334_vm2 }
 0x14f   :  { %v330_v1 = vsub.f32 1.0, %v329_v0 }
 0x151   :  { %v331_v4 = vmul.f32 %v371_v62, %v330_v1 }
 0x153   :  { %v332_v6 = vadd.f32 %v371_v62, %v331_v4 }
 0x155   :  { %v336_v8 = vsel %vm335_vm5, %v371_v62, %v332_v6 }
 0x156   :  { %v341_v9 = vsel %vm338_vm6, %v340_v7, %v336_v8 }
 0x157   :  { %v343_v10 = vsel %vm323_vm4, %v341_v9, %v307_v57 }
 0x158   :  { %345 = vst.msk [vmem:[#allocation2] sm:$0xff] %vm344_vm7, %v343_v10 }
 0x159   :  { %356 = dma.vmem_to_hbm [thread:$0]  %s352_s12, 128, %s354_s1, [#allocation3]  }
 0x15a   :  { %396 = dma.done.wait [#allocation3], 128  }
 0x15b   :  { %397 = vsyncadd [#allocation3], 4294967168 }
 0x15c   :  { %361 = vsyncpa [#allocation3], 1 }

</bundles_post_ra>
